<compile_context>
chip_gen: v5e
topology: v5e:2x2
jax: 0.10.0
libtpu: 0.0.40
codegen_flags: <defaults>
</compile_context>

<pallas_src>
import functools

import jax
import jax.numpy as jnp
from jax.experimental import pallas as pl
from jax.experimental.pallas import tpu as pltpu


# ----------------------------- kernels ------------------------------------ #

def _layer_norm_f32(z, gamma_f32, beta_f32, eps):
    mean = jnp.mean(z, axis=-1, keepdims=True)
    zc = z - mean
    var = jnp.mean(zc * zc, axis=-1, keepdims=True)
    return zc * jax.lax.rsqrt(var + eps) * gamma_f32 + beta_f32


def _ffn_resident_kernel(x_ref, w1_ref, b1_ref, w2_ref, b2_ref, g_ref, beta_ref,
                         o_ref, *, eps):
    """Weights-resident path: whole d_inner in one shot; W1/W2 block index is
    constant across the grid, so they are fetched from HBM exactly once."""
    h = jnp.dot(x_ref[...], w1_ref[...], preferred_element_type=jnp.float32)
    h = jnp.maximum(h + b1_ref[...].astype(jnp.float32), 0.0)
    y = jnp.dot(h.astype(w2_ref.dtype), w2_ref[...],
                preferred_element_type=jnp.float32)
    # dropout = identity (eval mode); bias + residual + LayerNorm in f32.
    z = y + b2_ref[...].astype(jnp.float32) + x_ref[...].astype(jnp.float32)
    out = _layer_norm_f32(z, g_ref[...].astype(jnp.float32),
                          beta_ref[...].astype(jnp.float32), eps)
    o_ref[...] = out.astype(o_ref.dtype)


def _ffn_streaming_kernel(x_ref, w1_ref, b1_ref, w2_ref, b2_ref, g_ref,
                          beta_ref, o_ref, acc_ref, *, eps):
    """Streaming path: d_inner tiled along an 'arbitrary' k grid axis with an
    f32 VMEM accumulator; x / out tiles stay resident across k."""
    k = pl.program_id(1)

    @pl.when(k == 0)
    def _init():
        # Seed the accumulator with the broadcast b2 bias (saves one epilogue add).
        acc_ref[...] = jnp.broadcast_to(b2_ref[...].astype(jnp.float32),
                                        acc_ref.shape)

    h = jnp.dot(x_ref[...], w1_ref[...], preferred_element_type=jnp.float32)
    h = jnp.maximum(h + b1_ref[...].astype(jnp.float32), 0.0)
    acc_ref[...] += jnp.dot(h.astype(w2_ref.dtype), w2_ref[...],
                            preferred_element_type=jnp.float32)

    @pl.when(k == pl.num_programs(1) - 1)
    def _finalize():
        z = acc_ref[...] + x_ref[...].astype(jnp.float32)
        out = _layer_norm_f32(z, g_ref[...].astype(jnp.float32),
                              beta_ref[...].astype(jnp.float32), eps)
        o_ref[...] = out.astype(o_ref.dtype)


# --------------------------- tiling helpers -------------------------------- #

def _round_up(x, m):
    return ((x + m - 1) // m) * m


def _vmem_capacity_bytes():
    try:
        cap = int(pltpu.get_tpu_info().vmem_capacity_bytes)
        if cap >= (16 << 20):
            return cap
    except Exception:
        pass
    return 64 * 1024 * 1024  # conservative: v7x per-TC VMEM


def _footprint_bytes(tm, tk, d_hid, c_it, out_it, resident):
    """Estimated VMEM footprint (double-buffered pipeline tiles + scratch +
    in-kernel intermediates), charged at actual byte widths."""
    fp = 0
    fp += 2 * tm * d_hid * c_it          # x tile (double-buffered)
    fp += 2 * tm * d_hid * out_it        # out tile
    fp += 2 * d_hid * tk * c_it          # W1 slab
    fp += 2 * tk * d_hid * c_it          # W2 slab
    fp += 2 * (tk + 3 * d_hid) * 4       # b1 slab + b2 / gamma / beta (f32)
    if not resident:
        fp += tm * d_hid * 4             # f32 accumulator scratch
    fp += tm * tk * (4 + c_it)           # hidden activation (f32 + cast copy)
    fp += 2 * tm * d_hid * 4             # LayerNorm / epilogue f32 temporaries
    return fp


def _choose_tiles(M, d_hid, d_inner, tile_m, tile_k, c_it, out_it,
                  weights_resident, fit_cap, gm):
    """Pick (tm, tk, resident). tm is sublane-granular; tk is lane-granular
    (or the full d_inner in the resident case)."""
    # Roofline-aware row tile request, rounded to the dtype-aware granule.
    tm = _round_up(min(tile_m, M), gm)
    # Keep >= 2 M-tiles when M allows so both v7x TensorCores get work.
    if M > gm and (M + tm - 1) // tm < 2:
        tm = _round_up((M + 1) // 2, gm)

    def shrink_m(t):
        return max(gm, _round_up(t // 2, gm))

    # --- resident fast path: weights loaded from HBM exactly once -----------
    if weights_resident is not False:
        floor = min(tm, max(gm, 128))
        t = tm
        while t >= floor:
            if _footprint_bytes(t, d_inner, d_hid, c_it, out_it, True) <= fit_cap:
                return t, d_inner, True
            if t == gm:
                break
            t = shrink_m(t)
        if weights_resident is True:
            t = tm
            while t > gm and _footprint_bytes(t, d_inner, d_hid, c_it, out_it,
                                              True) > fit_cap:
                t = shrink_m(t)
            return t, d_inner, True

    # --- streaming path: tile d_inner along an 'arbitrary' k axis -----------
    tk = min(_round_up(min(tile_k, d_inner), 128), _round_up(d_inner, 128))
    t = tm
    while True:
        if _footprint_bytes(t, tk, d_hid, c_it, out_it, False) <= fit_cap:
            return t, tk, False
        if tk > 128:
            tk = max(128, _round_up(tk // 2, 128))
        elif t > gm:
            t = shrink_m(t)
        else:
            return t, tk, False  # best effort; vmem limit is capped at HW size


# ------------------------------ wrapper ------------------------------------ #

def positionwise_ffn(x, w1, b1, w2, b2, gamma, beta, *, eps=1e-5,
                     compute_dtype=jnp.bfloat16, tile_m=512, tile_k=512,
                     weights_resident=None):
    """x: (B, L, d_hid); w1: (d_hid, d_inner); w2: (d_inner, d_hid).

    compute_dtype: dtype fed to the MXU (accumulation / LayerNorm stay f32).
    weights_resident: None = auto (fit-based), True/False = force.
    """
    B, L, d_hid = x.shape
    d_inner = w1.shape[1]
    M = B * L
    out_dtype = x.dtype

    c_dt = jnp.dtype(x.dtype) if compute_dtype is None else jnp.dtype(compute_dtype)
    c_it = c_dt.itemsize
    out_it = jnp.dtype(out_dtype).itemsize
    gm = max(8, 32 // c_it)          # sublane granule: 8 f32 / 16 bf16 / 32 int8

    hw_vmem = _vmem_capacity_bytes()
    vmem_cap = min(int(hw_vmem * 0.85), 112 * 1024 * 1024)
    fit_cap = int(vmem_cap * 0.9)

    tm, tk, resident = _choose_tiles(M, d_hid, d_inner, tile_m, tile_k,
                                     c_it, out_it, weights_resident, fit_cap, gm)

    # Rows padded to a multiple of tm (tail sliced off afterwards).
    Mp = _round_up(M, tm)
    x2d = x.reshape(M, d_hid).astype(c_dt)
    if Mp != M:
        x2d = jnp.pad(x2d, ((0, Mp - M), (0, 0)))

    w1c = w1.astype(c_dt)
    w2c = w2.astype(c_dt)
    b1f = b1.astype(jnp.float32)
    b2_2d = b2.astype(jnp.float32).reshape(1, d_hid)
    g_2d = gamma.astype(jnp.float32).reshape(1, d_hid)
    beta_2d = beta.astype(jnp.float32).reshape(1, d_hid)

    if resident:
        b1_2d = b1f.reshape(1, d_inner)
        footprint = _footprint_bytes(tm, d_inner, d_hid, c_it, out_it, True)
        vmem_limit = min(max(int(footprint * 1.4), 16 * 1024 * 1024), vmem_cap)
        grid = (Mp // tm,)

        out2d = pl.pallas_call(
            functools.partial(_ffn_resident_kernel, eps=eps),
            out_shape=jax.ShapeDtypeStruct((Mp, d_hid), out_dtype),
            grid_spec=pltpu.PrefetchScalarGridSpec(
                num_scalar_prefetch=0,
                grid=grid,
                in_specs=[
                    pl.BlockSpec((tm, d_hid), lambda i: (i, 0)),        # x rows
                    pl.BlockSpec((d_hid, d_inner), lambda i: (0, 0)),   # W1 (resident)
                    pl.BlockSpec((1, d_inner), lambda i: (0, 0)),       # b1
                    pl.BlockSpec((d_inner, d_hid), lambda i: (0, 0)),   # W2 (resident)
                    pl.BlockSpec((1, d_hid), lambda i: (0, 0)),         # b2
                    pl.BlockSpec((1, d_hid), lambda i: (0, 0)),         # gamma
                    pl.BlockSpec((1, d_hid), lambda i: (0, 0)),         # beta
                ],
                out_specs=pl.BlockSpec((tm, d_hid), lambda i: (i, 0)),
            ),
            compiler_params=pltpu.CompilerParams(
                dimension_semantics=("parallel",),
                vmem_limit_bytes=vmem_limit),
        )(x2d, w1c, b1_2d, w2c, b2_2d, g_2d, beta_2d)
    else:
        # Pad d_inner to a multiple of tk with zeros: zero W1 columns give
        # relu(0)=0 hidden lanes, which hit zero W2 rows -> no contribution.
        Dp = _round_up(d_inner, tk)
        if Dp != d_inner:
            w1c = jnp.pad(w1c, ((0, 0), (0, Dp - d_inner)))
            b1f = jnp.pad(b1f, (0, Dp - d_inner))
            w2c = jnp.pad(w2c, ((0, Dp - d_inner), (0, 0)))
        b1_2d = b1f.reshape(1, Dp)

        footprint = _footprint_bytes(tm, tk, d_hid, c_it, out_it, False)
        vmem_limit = min(max(int(footprint * 1.4), 16 * 1024 * 1024), vmem_cap)
        grid = (Mp // tm, Dp // tk)

        out2d = pl.pallas_call(
            functools.partial(_ffn_streaming_kernel, eps=eps),
            out_shape=jax.ShapeDtypeStruct((Mp, d_hid), out_dtype),
            grid_spec=pltpu.PrefetchScalarGridSpec(
                num_scalar_prefetch=0,
                grid=grid,
                in_specs=[
                    pl.BlockSpec((tm, d_hid), lambda i, k: (i, 0)),   # x rows (resident over k)
                    pl.BlockSpec((d_hid, tk), lambda i, k: (0, k)),   # W1 slab
                    pl.BlockSpec((1, tk), lambda i, k: (0, k)),       # b1 slab
                    pl.BlockSpec((tk, d_hid), lambda i, k: (k, 0)),   # W2 slab
                    pl.BlockSpec((1, d_hid), lambda i, k: (0, 0)),    # b2
                    pl.BlockSpec((1, d_hid), lambda i, k: (0, 0)),    # gamma
                    pl.BlockSpec((1, d_hid), lambda i, k: (0, 0)),    # beta
                ],
                out_specs=pl.BlockSpec((tm, d_hid), lambda i, k: (i, 0)),
                scratch_shapes=[pltpu.VMEM((tm, d_hid), jnp.float32)],
            ),
            compiler_params=pltpu.CompilerParams(
                dimension_semantics=("parallel", "arbitrary"),
                vmem_limit_bytes=vmem_limit),
        )(x2d, w1c, b1_2d, w2c, b2_2d, g_2d, beta_2d)

    if Mp != M:
        out2d = out2d[:M]
    return out2d.reshape(B, L, d_hid)


# ----------------------------- reference ----------------------------------- #

def reference_ffn(x, w1, b1, w2, b2, gamma, beta, eps=1e-5):
    prec = jax.lax.Precision.HIGHEST
    h = jnp.maximum(jnp.einsum("bld,di->bli", x, w1, precision=prec) + b1, 0.0)
    y = jnp.einsum("bli,id->bld", h, w2, precision=prec) + b2
    z = y + x
    mean = jnp.mean(z, axis=-1, keepdims=True)
    var = jnp.mean((z - mean) ** 2, axis=-1, keepdims=True)
    return (z - mean) / jnp.sqrt(var + eps) * gamma + beta


# -------------------------------- test -------------------------------------- #

if __name__ == "__main__":
    def run_case(B, L, d_hid, d_inner, *, compute_dtype, weights_resident,
                 tile_m, tile_k, atol, rtol):
        key = jax.random.PRNGKey(0)
        kx, k1, k2, k3, k4, k5 = jax.random.split(key, 6)

        x = jax.random.normal(kx, (B, L, d_hid), dtype=jnp.float32)
        # Conv1d(d_hid, d_inner, 1) weight (d_inner, d_hid, 1) is stored here
        # pre-transposed as (d_hid, d_inner) for a row-major matmul; same for w_2.
        w1 = (jax.random.normal(k1, (d_hid, d_inner), dtype=jnp.float32)
              * (1.0 / jnp.sqrt(d_hid)))
        b1 = jax.random.normal(k2, (d_inner,), dtype=jnp.float32) * 0.01
        w2 = (jax.random.normal(k3, (d_inner, d_hid), dtype=jnp.float32)
              * (1.0 / jnp.sqrt(d_inner)))
        b2 = jax.random.normal(k4, (d_hid,), dtype=jnp.float32) * 0.01
        gamma = 1.0 + 0.1 * jax.random.normal(k5, (d_hid,), dtype=jnp.float32)
        beta = jnp.zeros((d_hid,), dtype=jnp.float32)

        out = positionwise_ffn(x, w1, b1, w2, b2, gamma, beta,
                               compute_dtype=compute_dtype,
                               weights_resident=weights_resident,
                               tile_m=tile_m, tile_k=tile_k)
        out = jax.block_until_ready(out)
        ref = reference_ffn(x, w1, b1, w2, b2, gamma, beta)
        assert out.shape == (B, L, d_hid)
        assert jnp.allclose(out, ref, atol=atol, rtol=rtol), (
            f"mismatch vs reference for shape {(B, L, d_hid, d_inner)}")

    # 1) Small module-spec shapes, f32 compute -> resident path, tight check.
    run_case(B=2, L=8, d_hid=32, d_inner=64,
             compute_dtype=jnp.float32, weights_resident=None,
             tile_m=512, tile_k=512, atol=1e-4, rtol=1e-4)
    # 2) Non-multiple M (row padding) with the default bf16 compute path.
    run_case(B=2, L=9, d_hid=32, d_inner=64,
             compute_dtype=jnp.bfloat16, weights_resident=None,
             tile_m=512, tile_k=512, atol=5e-2, rtol=5e-2)
    # 3) Forced streaming path, f32: d_inner padding (384 -> 512), 2 M-tiles,
    #    k-axis accumulator init/finalize.
    run_case(B=2, L=64, d_hid=128, d_inner=384,
             compute_dtype=jnp.float32, weights_resident=False,
             tile_m=512, tile_k=256, atol=1e-4, rtol=1e-4)
    # 4) Forced streaming path, bf16: multi-k accumulation with bf16 operands.
    run_case(B=2, L=32, d_hid=128, d_inner=512,
             compute_dtype=jnp.bfloat16, weights_resident=False,
             tile_m=512, tile_k=128, atol=5e-2, rtol=5e-2)

    print("KERNEL_OK")
</pallas_src>

<mosaic_0001>
module attributes {stable_mosaic.version = 11 : i64} {
  func.func @_ffn_resident_kernel(%arg0: i32, %arg1: memref<8x32xf32, #tpu.memory_space<vmem>>, %arg2: memref<32x64xf32, #tpu.memory_space<vmem>>, %arg3: memref<1x64xf32, #tpu.memory_space<vmem>>, %arg4: memref<64x32xf32, #tpu.memory_space<vmem>>, %arg5: memref<1x32xf32, #tpu.memory_space<vmem>>, %arg6: memref<1x32xf32, #tpu.memory_space<vmem>>, %arg7: memref<1x32xf32, #tpu.memory_space<vmem>>, %arg8: memref<8x32xf32, #tpu.memory_space<vmem>>) attributes {dimension_semantics = [#tpu.dimension_semantics<parallel>], iteration_bounds = array<i64: 2>, scalar_prefetch = 0 : i64, scratch_operands = 0 : i64, tpu.core_type = #tpu.core_type<tc>, window_params = [{transform_indices = @transform_0, window_bounds = array<i64: 8, 32>}, {pipeline_mode = #tpu.pipeline_mode<synchronous>, transform_indices = @transform_1, window_bounds = array<i64: 32, 64>}, {pipeline_mode = #tpu.pipeline_mode<synchronous>, transform_indices = @transform_2, window_bounds = array<i64: 1, 64>}, {pipeline_mode = #tpu.pipeline_mode<synchronous>, transform_indices = @transform_3, window_bounds = array<i64: 64, 32>}, {pipeline_mode = #tpu.pipeline_mode<synchronous>, transform_indices = @transform_4, window_bounds = array<i64: 1, 32>}, {pipeline_mode = #tpu.pipeline_mode<synchronous>, transform_indices = @transform_5, window_bounds = array<i64: 1, 32>}, {pipeline_mode = #tpu.pipeline_mode<synchronous>, transform_indices = @transform_6, window_bounds = array<i64: 1, 32>}, {transform_indices = @transform_7, window_bounds = array<i64: 8, 32>}]} {
    %c0 = arith.constant 0 : index
    %c0_0 = arith.constant 0 : index
    %0 = vector.load %arg1[%c0, %c0_0] : memref<8x32xf32, #tpu.memory_space<vmem>>, vector<8x32xf32>
    %c0_1 = arith.constant 0 : index
    %c0_2 = arith.constant 0 : index
    %1 = vector.load %arg2[%c0_1, %c0_2] : memref<32x64xf32, #tpu.memory_space<vmem>>, vector<32x64xf32>
    %cst = arith.constant dense<0.000000e+00> : vector<8x64xf32>
    %2 = tpu.matmul %0, %1, %cst {dimension_numbers = #tpu.dot_dimension_numbers<[1], [0], [0], [1], [0, 0, 1, 1], [], []>} : vector<8x32xf32>, vector<32x64xf32>, vector<8x64xf32> -> vector<8x64xf32>
    %c0_3 = arith.constant 0 : index
    %c0_4 = arith.constant 0 : index
    %3 = vector.load %arg3[%c0_3, %c0_4] : memref<1x64xf32, #tpu.memory_space<vmem>>, vector<1x64xf32>
    %4 = vector.broadcast %3 : vector<1x64xf32> to vector<8x64xf32>
    %5 = arith.addf %2, %4 : vector<8x64xf32>
    %cst_5 = arith.constant 0.000000e+00 : f32
    %6 = vector.broadcast %cst_5 : f32 to vector<8x64xf32>
    %7 = arith.maximumf %5, %6 : vector<8x64xf32>
    %c0_6 = arith.constant 0 : index
    %c0_7 = arith.constant 0 : index
    %8 = vector.load %arg4[%c0_6, %c0_7] : memref<64x32xf32, #tpu.memory_space<vmem>>, vector<64x32xf32>
    %cst_8 = arith.constant dense<0.000000e+00> : vector<8x32xf32>
    %9 = tpu.matmul %7, %8, %cst_8 {dimension_numbers = #tpu.dot_dimension_numbers<[1], [0], [0], [1], [0, 0, 1, 1], [], []>} : vector<8x64xf32>, vector<64x32xf32>, vector<8x32xf32> -> vector<8x32xf32>
    %c0_9 = arith.constant 0 : index
    %c0_10 = arith.constant 0 : index
    %10 = vector.load %arg5[%c0_9, %c0_10] : memref<1x32xf32, #tpu.memory_space<vmem>>, vector<1x32xf32>
    %11 = vector.broadcast %10 : vector<1x32xf32> to vector<8x32xf32>
    %12 = arith.addf %9, %11 : vector<8x32xf32>
    %c0_11 = arith.constant 0 : index
    %c0_12 = arith.constant 0 : index
    %13 = vector.load %arg1[%c0_11, %c0_12] : memref<8x32xf32, #tpu.memory_space<vmem>>, vector<8x32xf32>
    %14 = arith.addf %12, %13 : vector<8x32xf32>
    %c0_13 = arith.constant 0 : index
    %c0_14 = arith.constant 0 : index
    %15 = vector.load %arg6[%c0_13, %c0_14] : memref<1x32xf32, #tpu.memory_space<vmem>>, vector<1x32xf32>
    %c0_15 = arith.constant 0 : index
    %c0_16 = arith.constant 0 : index
    %16 = vector.load %arg7[%c0_15, %c0_16] : memref<1x32xf32, #tpu.memory_space<vmem>>, vector<1x32xf32>
    %cst_17 = arith.constant dense<0.000000e+00> : vector<8xf32>
    %17 = vector.multi_reduction <add>, %14, %cst_17 [1] : vector<8x32xf32> to vector<8xf32>
    %18 = vector.shape_cast %17 : vector<8xf32> to vector<8x1xf32>
    %cst_18 = arith.constant 3.200000e+01 : f32
    %19 = vector.broadcast %cst_18 : f32 to vector<8x1xf32>
    %20 = arith.divf %18, %19 : vector<8x1xf32>
    %21 = vector.broadcast %20 : vector<8x1xf32> to vector<8x32xf32>
    %22 = arith.subf %14, %21 : vector<8x32xf32>
    %23 = arith.mulf %22, %22 : vector<8x32xf32>
    %cst_19 = arith.constant dense<0.000000e+00> : vector<8xf32>
    %24 = vector.multi_reduction <add>, %23, %cst_19 [1] : vector<8x32xf32> to vector<8xf32>
    %25 = vector.shape_cast %24 : vector<8xf32> to vector<8x1xf32>
    %cst_20 = arith.constant 3.200000e+01 : f32
    %26 = vector.broadcast %cst_20 : f32 to vector<8x1xf32>
    %27 = arith.divf %25, %26 : vector<8x1xf32>
    %cst_21 = arith.constant 9.99999974E-6 : f32
    %28 = vector.broadcast %cst_21 : f32 to vector<8x1xf32>
    %29 = arith.addf %27, %28 : vector<8x1xf32>
    %30 = math.rsqrt %29 : vector<8x1xf32>
    %31 = vector.broadcast %30 : vector<8x1xf32> to vector<8x32xf32>
    %32 = arith.mulf %22, %31 : vector<8x32xf32>
    %33 = vector.broadcast %15 : vector<1x32xf32> to vector<8x32xf32>
    %34 = arith.mulf %32, %33 : vector<8x32xf32>
    %35 = vector.broadcast %16 : vector<1x32xf32> to vector<8x32xf32>
    %36 = arith.addf %34, %35 : vector<8x32xf32>
    %c0_22 = arith.constant 0 : index
    %c0_23 = arith.constant 0 : index
    %37 = vector.load %arg8[%c0_22, %c0_23] : memref<8x32xf32, #tpu.memory_space<vmem>>, vector<8x32xf32>
    tpu.vector_store %arg8[%c0_22, %c0_23], %36 {strides = array<i32>} : memref<8x32xf32, #tpu.memory_space<vmem>>, vector<8x32xf32>,
    return
  }
  func.func @transform_0(%arg0: i32) -> (i32, i32) {
    %c0_i32 = arith.constant 0 : i32
    %c0_i32_0 = arith.constant 0 : i32
    return %arg0, %c0_i32 : i32, i32
  }
  func.func @transform_1(%arg0: i32) -> (i32, i32) {
    %c0_i32 = arith.constant 0 : i32
    %c0_i32_0 = arith.constant 0 : i32
    %c0_i32_1 = arith.constant 0 : i32
    return %c0_i32, %c0_i32_0 : i32, i32
  }
  func.func @transform_2(%arg0: i32) -> (i32, i32) {
    %c0_i32 = arith.constant 0 : i32
    %c0_i32_0 = arith.constant 0 : i32
    %c0_i32_1 = arith.constant 0 : i32
    return %c0_i32, %c0_i32_0 : i32, i32
  }
  func.func @transform_3(%arg0: i32) -> (i32, i32) {
    %c0_i32 = arith.constant 0 : i32
    %c0_i32_0 = arith.constant 0 : i32
    %c0_i32_1 = arith.constant 0 : i32
    return %c0_i32, %c0_i32_0 : i32, i32
  }
  func.func @transform_4(%arg0: i32) -> (i32, i32) {
    %c0_i32 = arith.constant 0 : i32
    %c0_i32_0 = arith.constant 0 : i32
    %c0_i32_1 = arith.constant 0 : i32
    return %c0_i32, %c0_i32_0 : i32, i32
  }
  func.func @transform_5(%arg0: i32) -> (i32, i32) {
    %c0_i32 = arith.constant 0 : i32
    %c0_i32_0 = arith.constant 0 : i32
    %c0_i32_1 = arith.constant 0 : i32
    return %c0_i32, %c0_i32_0 : i32, i32
  }
  func.func @transform_6(%arg0: i32) -> (i32, i32) {
    %c0_i32 = arith.constant 0 : i32
    %c0_i32_0 = arith.constant 0 : i32
    %c0_i32_1 = arith.constant 0 : i32
    return %c0_i32, %c0_i32_0 : i32, i32
  }
  func.func @transform_7(%arg0: i32) -> (i32, i32) {
    %c0_i32 = arith.constant 0 : i32
    %c0_i32_0 = arith.constant 0 : i32
    return %arg0, %c0_i32 : i32, i32
  }
}

</mosaic_0001>

<bundles_post_ra>
// kernel: tpu_custom_call.1
= control target key start
LH: loop header
LB: loop body
LE: loop exit
PB: predicated region body
PF: predicated region fallthrough
CT: control target
= control target key end

     0   :  { %12 = vsyncpa [#allocation3], 0  ;;  %s762_s0 = inlined_call_operand.vmem [shape: f32[16,32], index: 0, kind: input, shape index: {}]   ;;  %s763_s1 = inlined_call_operand.vmem [shape: f32[32,64], index: 1, kind: input, shape index: {}]   ;;  %s764_s2 = inlined_call_operand.vmem [shape: f32[1,64], index: 2, kind: input, shape index: {}]   ;;  %s765_s3 = inlined_call_operand.vmem [shape: f32[64,32], index: 3, kind: input, shape index: {}]   ;;  %s766_s4 = inlined_call_operand.vmem [shape: f32[1,32], index: 4, kind: input, shape index: {}]   ;;  %s767_s5 = inlined_call_operand.vmem [shape: f32[1,32], index: 5, kind: input, shape index: {}]   ;;  %s768_s6 = inlined_call_operand.vmem [shape: f32[1,32], index: 6, kind: input, shape index: {}]   ;;  %s769_s7 = inlined_call_operand.hbm [shape: f32[16,32], index: 7, kind: output, shape index: {}]  }
   0x1   :  { %14 = vsyncpa [#allocation3 + $0x1], 0  ;;  %s625_s24 = smov 0   ;;  %s627_s25 = smov 0  }
   0x2   :  { %s629_s26 = smov 0   ;;  %s631_s27 = smov 0  }
   0x3 LB: > { %s646_s28 = sadd.s32 4294967295, %s582_s27   ;;  %s460_s29 = sadd.s32 4294967294, %s582_s27   ;;  %s582_s27 = sphi %s631_s27, %s775_s27   ;;  %s578_s26 = sphi %s629_s26, %s774_s26   ;;  %s574_s25 = sphi %s627_s25, %s773_s25   ;;  %s570_s24 = sphi %s625_s24, %s772_s24  }
   0x4   : > { %s650_s30 = sadd.s32 1, %s582_s27   ;;  %s179_s8 = sadd.s32 1, %s578_s26 }
   0x5   : > { %s176_s9 = ssub.s32 %s582_s27, %s650_s30  ;;  %p189_p0 = scmp.ne.s32.totalorder %s578_s26, %s574_s25 }
   0x6   : > { %p177_p1 = scmp.eq.s32.totalorder %s176_s9, 0  ;;  %p190_p2 = scmp.eq.s32.totalorder %s646_s28, 1 }
   0x7   : > { %p195_p3 = scmp.ne.s32.totalorder %s574_s25, %s570_s24  ;;  %p196_p4 = scmp.eq.s32.totalorder %s460_s29, 1 }
   0x8   : > { %s661_s10 = scalar_select %p177_p1, %s578_s26, %s179_s8  }
   0x9   : > { %p663_p5 = por %p190_p2, %p189_p0  ;;  %p667_p6 = por %p196_p4, %p195_p3 }
   0xa   : > { %p463_p7 = scmp.ge.s32.totalorder %s582_s27, 1  ;;  %p239_p8 = scmp.lt.s32.totalorder %s582_s27, 3 }
   0xc   : > { %p240_p9 = pnand %p463_p7, %p239_p8 }
   0xd   : > { %p270_p10 = scmp.lt.s32.totalorder (!%p240_p9), %s646_s28, 1  ;;  %s267_s18 = sand.u32 (!%p240_p9), 1, %s574_s25  }
   0xe   : > { %243 = sbr.rel (%p240_p9) target bundleno = 558 (0x22e), region = 48  ;;  %s464_s19 = sshll.u32 (!%p240_p9), %s267_s18, 3 }
   0xf   : > { %s469_s20 = sshll.u32 (!%p240_p9), %s646_s28, 3  ;;  %s386_s16 = scalar_lea.sflag (!%p240_p9), [#allocation3], %s267_s18 }
  0x10   : > { %s396_s8 = scalar_lea.hbm (!%p240_p9), %s769_s7, %s469_s20 }
  0x11   : > { %s400_s15 = sshll.u32 (!%p240_p9), %s396_s8, 4  ;;  %s401_s15 = int_to_ptr.hbm [resolvable:$true] %s400_s15 }
  0x13   : > { %v278_v0 = vld [vmem:[%s763_s1 + $0x18] sm:$0xff]  ;;  %v277_v1 = vld [vmem:[%s763_s1 + $0x10] sm:$0xff]  ;;  %v276_v4 = vld [vmem:[%s763_s1 + $0x8] sm:$0xff]  ;;  %s271_s23 = scalar_select %p270_p10, %s646_s28, 1  ;;  %vm283_vm0 = vcmask 261120   ;;  %vm320_vm1 = vcmask 523264  }
  0x14   : > { %299 = vmatpush.msra.mxu0 %v278_v0  ;;  %v315_v2 = vld [vmem:[%s765_s3 + $0x38] sm:$0xff]  ;;  %v314_v3 = vld [vmem:[%s765_s3 + $0x30] sm:$0xff]  ;;  %v313_v5 = vld [vmem:[%s765_s3 + $0x28] sm:$0xff]  ;;  %v584_v22 = vmov 32.0  }
  0x15   : > { %332 = vmatpush.msra.mxu1 %v315_v2  ;;  %v275_v6 = vld [vmem:[%s763_s1] sm:$0xff]  ;;  %s465_s14 = sshll.u32 %s271_s23, 3  ;;  %v311_v9 = vld [vmem:[%s765_s3 + $0x18] sm:$0xff]  ;;  %v310_v10 = vld [vmem:[%s765_s3 + $0x10] sm:$0xff]  ;;  %516 = vrcp.f32 %v584_v22 }
  0x16   : > { %300 = vmatpush.msra.mxu0 %v277_v1  ;;  %s273_s17 = scalar_lea.vmem %s762_s0, %s465_s14  ;;  %v312_v7 = vld [vmem:[%s765_s3 + $0x20] sm:$0xff]  ;;  %v309_v11 = vld [vmem:[%s765_s3 + $0x8] sm:$0xff]  ;;  %s269_s14 = scalar_lea.vmem [#allocation2], %s464_s19 }
  0x17   : > { %333 = vmatpush.msra.mxu1 %v314_v3  ;;  %v274_v8 = vld [vmem:[%s273_s17] sm:$0xff]  ;;  %s398_s28 = sshll.u32 %s269_s14, 4  ;;  %s534_s17 = sshra.s32 %s401_s15, 4  ;;  %s399_s28 = int_to_ptr.vmem [resolvable:$true] %s398_s28  ;;  %s535_s17 = int_to_ptr.hbm [resolvable:$true] %s534_s17 }
  0x18   : > { %301 = vmatpush.msra.mxu0 %v276_v4  ;;  %v308_v12 = vld [vmem:[%s765_s3] sm:$0xff]  ;;  %s536_s20 = scalar_lea.hbm %s535_s17, 8  ;;  %s540_s19 = scalar_lea.hbm %s769_s7, 16 }
  0x19   : > { %334 = vmatpush.msra.mxu1 %v313_v5  ;;  %v512_v13 = vld [vmem:[%s764_s2] ss:$0 sm:$0xff]  ;;  %p537_p11 = scmp.ne.s32.totalorder %s535_s17, %s536_s20  ;;  %p541_p0 = scmp.lt.s32.totalorder %s535_s17, %s769_s7 }
  0x1a   : > { %302 = vmatpush.msra.mxu0 %v275_v6  ;;  %v513_v17 = vld [vmem:[%s766_s4] ss:$0 sm:$0xff]  ;;  %p542_p1 = scmp.lt.s32.totalorder %s540_s19, %s536_s20 }
  0x1b   : > { %466 = vmatmul.msk.f32.vlgmr.msra.gmra.mxu0 %vm283_vm0, %v274_v8  ;;  %335 = vmatpush.msra.mxu1 %v312_v7  ;;  %v517_v23 = vpop.eup %516  ;;  %v514_v43 = vld [vmem:[%s767_s5] ss:$0 sm:$0xff]  ;;  %p538_p12 = pnand %p537_p11, %p663_p5 }
  0x1c   : > { %v351_v24 = vmul.f32 32.0, %v517_v23  ;;  %vm355_vm2 = vweird.f32 %v517_v23  ;;  %v515_v46 = vld [vmem:[%s768_s6] ss:$0 sm:$0xff]  ;;  %p543_p2 = por %p542_p1, %p541_p0 }
  0x1d   : > { %336 = vmatpush.msra.mxu1 %v311_v9  ;;  %p539_p13 = pneg %p538_p12 }
  0x1e   : > { %v352_v25 = vsub.f32 1.0, %v351_v24 }
  0x1f   : > { %337 = vmatpush.msra.mxu1 %v310_v10  ;;  %p544_p3 = pnand %p543_p2, %p539_p13 }
  0x20   : > { %v353_v26 = vmul.f32 %v517_v23, %v352_v25 }
  0x21   : > { %338 = vmatpush.msra.mxu1 %v309_v11 }
  0x22   : > { %v354_v27 = vadd.f32 %v517_v23, %v353_v26 }
  0x23   : > { %339 = vmatpush.msra.mxu1 %v308_v12 }
  0x24   : > { %v356_v28 = vsel %vm355_vm2, %v517_v23, %v354_v27 }
  0x98   : > { %v304_v14 = vpop.f32.mrf.mxu0 }
  0x99   : > { %v305_v15 = vadd.f32 %v512_v13, %v304_v14 }
  0x9b   : > { %v307_v16 = vmax.f32 %v305_v15, 0.0 }
  0x9d   : > { %467 = vmatmul.msk.f32.vlgmr.msra.gmra.mxu1 %vm320_vm1, %v307_v16 }
 0x11a   : > { %v341_v18 = vpop.f32.mrf.mxu1 }
 0x11b   : > { %v342_v19 = vadd.f32 %v513_v17, %v341_v18 }
 0x11d   : > { %v344_v20 = vadd.f32 %v342_v19, %v274_v8 }
 0x11f   : > { %v347_v21 = vsel %vm283_vm0, %v344_v20, 0.0 }
 0x120   : > { %348 = vadd.xlane.f32.xlu0 %v347_v21 }
 0x193   : > { %v349_v29 = vpop.xlane.xlu0 %348 }
 0x194   : > { %v357_v30 = vmul.f32 %v356_v28, %v349_v29 }
 0x196   : > { %v358_v31 = vsub.f32 %v344_v20, %v357_v30 }
 0x198   : > { %v359_v32 = vmul.f32 %v358_v31, %v358_v31 }
 0x19a   : > { %v360_v33 = vsel %vm283_vm0, %v359_v32, 0.0 }
 0x19b   : > { %361 = vadd.xlane.f32.xlu0 %v360_v33 }
 0x20e   : > { %v362_v34 = vpop.xlane.xlu0 %361 }
 0x20f   : > { %v363_v35 = vmul.f32 %v362_v34, %v356_v28 }
 0x211   : > { %v364_v36 = vadd.f32 1e-05, %v363_v35 }
 0x213   : > { %518 = vrsqrt.f32 %v364_v36  ;;  %vm371_vm4 = vweird.f32 %v364_v36 }
 0x219   : > { %v519_v37 = vpop.eup %518 }
 0x21a   : > { %v366_v38 = vmul.f32 %v519_v37, %v364_v36  ;;  %vm372_vm3 = vweird.f32 %v519_v37 }
 0x21b   : > { %vm373_vm5 = vmor %vm371_vm4, %vm372_vm3 }
 0x21c   : > { %v367_v39 = vmul.f32 %v519_v37, %v366_v38 }
 0x21e   : > { %v368_v40 = vmul.f32 0.5, %v367_v39 }
 0x220   : > { %v369_v41 = vsub.f32 1.5, %v368_v40 }
 0x222   : > { %v370_v42 = vmul.f32 %v519_v37, %v369_v41 }
 0x224   : > { %v374_v44 = vsel %vm373_vm5, %v519_v37, %v370_v42 }
 0x225   : > { %v375_v45 = vmul.f32 %v374_v44, %v358_v31 }
 0x227   : > { %v379_v47 = vmul.f32 %v514_v43, %v375_v45 }
 0x229   : > { %v383_v48 = vadd.f32 %v515_v46, %v379_v47 }
 0x22b   : > { %384 = vst.msk [vmem:[%s269_s14] sm:$0xff] %vm283_vm0, %v383_v48 }
 0x22c   : > { %547 = shalt.err (!%p544_p3)
}
 0x22d   : > { %472 = dma.vmem_to_hbm [thread:$0]  (%p663_p5), %s399_s28, 128, %s401_s15, %s386_s16  }
 0x22e PF: > { %p478_p4 = scmp.ge.s32.totalorder %s582_s27, 2  ;;  %s412_s18 = sand.u32 1, %s570_s24  }
 0x22f   : > { %s413_s8 = scalar_lea.sflag [#allocation3], %s412_s18 }
 0x230   : > { %p475_p7 = pnand %p478_p4, %p667_p6 }
 0x232   : > { %p476_p8 = pneg %p475_p7 }
 0x234   : > { %565 = dma.done.wait (%p476_p8), %s413_s8, 128  }
 0x235   : > { %567 = vsyncadd (%p476_p8), %s413_s8, 4294967168  ;;  %p17_p9 = scmp.ge.s32.totalorder %s650_s30, 4   ;;  %s772_s24 = smov %s574_s25 }
 0x236   : > { %s773_s25 = smov %s578_s26  ;;  %s774_s26 = smov %s661_s10 }
 0x237   : > { %s775_s27 = smov %s650_s30  ;;  %19 = sbr.rel (!%p17_p9) target bundleno = 3 (0x3), region = 83 }
 0x23c   :  { %419 = vsyncpa [#allocation3], 1 }
 0x23d   :  { %421 = vsyncpa [#allocation3 + $0x1], 1 }

</bundles_post_ra>
